<compile_context>
chip_gen: v7x
topology: tpu7x:2x2x1
jax: 0.10.0
libtpu: 0.0.40
codegen_flags: <defaults>
</compile_context>

<pallas_src>
import jax
import jax.numpy as jnp
from jax.experimental import pallas as pl
from jax.experimental.pallas import tpu as pltpu


def _round_up(n, m):
    return ((n + m - 1) // m) * m


def _mlp_kernel(x_ref, w1_ref, b1_ref, w2_ref, b2_ref, w3_ref, b3_ref, o_ref):
    """Fused MLP forward for one batch tile: (Linear+ReLU) x2 then final Linear.

    x arrives in its native dtype (f32 here) and is cast to bf16 in-kernel;
    weights are bf16 (MXU-native); biases and accumulation are f32.
    """
    x = x_ref[...].astype(jnp.bfloat16)              # (TB, 784)

    # Layer 1: Linear(784 -> H1_pad) + ReLU  (Dropout is identity in eval mode)
    h1 = jnp.dot(x, w1_ref[...], preferred_element_type=jnp.float32)
    h1 = jnp.maximum(h1 + b1_ref[...], 0.0)          # f32 VPU work

    # Layer 2: Linear(H1_pad -> H2_pad) + ReLU
    h2 = jnp.dot(h1.astype(jnp.bfloat16), w2_ref[...],
                 preferred_element_type=jnp.float32)
    h2 = jnp.maximum(h2 + b2_ref[...], 0.0)

    # Output layer: Linear(H2_pad -> C_pad), no activation
    logits = jnp.dot(h2.astype(jnp.bfloat16), w3_ref[...],
                     preferred_element_type=jnp.float32)
    o_ref[...] = (logits + b3_ref[...]).astype(o_ref.dtype)   # bf16 writeback


def prepare_params(params, input_dim=784):
    """Pad hidden/output feature dims to multiples of 128, cast weights to bf16.

    The input (K=784) dim is NOT padded. Zero padding of hidden/output dims is
    exact: padded hidden columns are ReLU(0 + 0) = 0 and padded output columns
    get zero weights + zero bias (and are sliced off afterwards).
    """
    w1, b1 = params["w1"], params["b1"]   # (784, H1), (1, H1)
    w2, b2 = params["w2"], params["b2"]   # (H1, H2),  (1, H2)
    w3, b3 = params["w3"], params["b3"]   # (H2, C),   (1, C)

    H1_pad = _round_up(w1.shape[1], 128)
    H2_pad = _round_up(w2.shape[1], 128)
    C_pad = _round_up(w3.shape[1], 128)

    def pad2(a, r, c):
        return jnp.pad(a, ((0, r - a.shape[0]), (0, c - a.shape[1])))

    return {
        "w1": pad2(w1, input_dim, H1_pad).astype(jnp.bfloat16),  # rows unpadded
        "b1": pad2(b1, 1, H1_pad).astype(jnp.float32),
        "w2": pad2(w2, H1_pad, H2_pad).astype(jnp.bfloat16),
        "b2": pad2(b2, 1, H2_pad).astype(jnp.float32),
        "w3": pad2(w3, H2_pad, C_pad).astype(jnp.bfloat16),
        "b3": pad2(b3, 1, C_pad).astype(jnp.float32),
        "num_classes": w3.shape[1],
        "input_dim": input_dim,
    }


def _choose_batch_tile(B, tb_max):
    """Pick the batch tile.

    Small batches use a single full-batch block (block dim == array dim is
    always legal). Larger batches get >= 2 tiles of multiple-of-8 rows so
    v7x's second TensorCore gets work; the partial trailing tile (if any) is
    handled by Pallas' masked boundary writes, so no batch padding is needed.
    """
    if B <= 256:
        return B
    return min(tb_max, _round_up(pl.cdiv(B, 2), 8))


def mlp_forward(x, prepared, *, tb_max=1024):
    """x: any shape reshaping to (-1, input_dim); prepared: prepare_params output."""
    input_dim = prepared["input_dim"]
    num_classes = prepared["num_classes"]

    w1, b1 = prepared["w1"], prepared["b1"]
    w2, b2 = prepared["w2"], prepared["b2"]
    w3, b3 = prepared["w3"], prepared["b3"]

    H1_pad = w1.shape[1]
    H2_pad = w2.shape[1]
    C_pad = w3.shape[1]

    x2d = x.reshape(-1, input_dim)          # matches x.view(-1, 784)
    B = x2d.shape[0]

    TB = _choose_batch_tile(B, tb_max)
    grid = (pl.cdiv(B, TB),)

    const = lambda i: (0, 0)   # weights/biases resident in VMEM across the grid

    out = pl.pallas_call(
        _mlp_kernel,
        out_shape=jax.ShapeDtypeStruct((B, C_pad), jnp.bfloat16),
        grid_spec=pl.GridSpec(
            grid=grid,
            in_specs=[
                pl.BlockSpec((TB, input_dim), lambda i: (i, 0)),  # x: batch-tiled
                pl.BlockSpec((input_dim, H1_pad), const),
                pl.BlockSpec((1, H1_pad), const),
                pl.BlockSpec((H1_pad, H2_pad), const),
                pl.BlockSpec((1, H2_pad), const),
                pl.BlockSpec((H2_pad, C_pad), const),
                pl.BlockSpec((1, C_pad), const),
            ],
            out_specs=pl.BlockSpec((TB, C_pad), lambda i: (i, 0)),
        ),
        compiler_params=pltpu.CompilerParams(
            dimension_semantics=("parallel",),   # v7x: batch tiles split across 2 TCs
        ),
    )(x2d, w1, b1, w2, b2, w3, b3)

    # Tiny slice of the real classes; cast back to f32 to match the PyTorch
    # module's output dtype (precision already set by bf16 matmuls).
    return out[:, :num_classes].astype(jnp.float32)


def init_params(key, hidden_units=(128, 64), input_dim=784, num_classes=10):
    """Deterministic PyTorch-style (uniform +-1/sqrt(fan_in)) init.

    Weights are stored already transposed: (in_features, out_features).
    """
    dims = [input_dim, *hidden_units, num_classes]
    params = {}
    for i in range(len(dims) - 1):
        fan_in, fan_out = dims[i], dims[i + 1]
        key, kw, kb = jax.random.split(key, 3)
        bound = 1.0 / jnp.sqrt(fan_in)
        params[f"w{i+1}"] = jax.random.uniform(
            kw, (fan_in, fan_out), jnp.float32, minval=-bound, maxval=bound)
        params[f"b{i+1}"] = jax.random.uniform(
            kb, (1, fan_out), jnp.float32, minval=-bound, maxval=bound)
    return params


def mlp_ref(x, params):
    """Pure-JAX f32 reference for correctness check."""
    h = x.reshape(-1, 784).astype(jnp.float32)
    h = jnp.maximum(h @ params["w1"] + params["b1"], 0.0)
    h = jnp.maximum(h @ params["w2"] + params["b2"], 0.0)
    return h @ params["w3"] + params["b3"]


if __name__ == "__main__":
    key = jax.random.PRNGKey(0)
    key, kx = jax.random.split(key)

    # FashionMNIST-like input: batch=2, 1x28x28 -> flattened to (2, 784)
    x = jax.random.normal(kx, (2, 1, 28, 28), dtype=jnp.float32)

    params = init_params(key, hidden_units=(128, 64),
                         input_dim=784, num_classes=10)
    prepared = prepare_params(params, input_dim=784)

    out = jax.block_until_ready(mlp_forward(x, prepared))

    ref = mlp_ref(x, params)
    assert out.shape == (2, 10), out.shape
    # bf16 matmul inputs + bf16 logits writeback with f32 accumulation ->
    # loosen tolerance vs the f32 reference.
    assert jnp.allclose(out, ref, atol=3e-2, rtol=3e-2), \
        float(jnp.max(jnp.abs(out - ref)))

    print("KERNEL_OK")
</pallas_src>

<mosaic_0001>
module attributes {stable_mosaic.version = 11 : i64} {
  func.func @_mlp_kernel(%arg0: i32, %arg1: memref<2x784xf32, #tpu.memory_space<vmem>>, %arg2: memref<784x128xbf16, #tpu.memory_space<vmem>>, %arg3: memref<1x128xf32, #tpu.memory_space<vmem>>, %arg4: memref<128x128xbf16, #tpu.memory_space<vmem>>, %arg5: memref<1x128xf32, #tpu.memory_space<vmem>>, %arg6: memref<128x128xbf16, #tpu.memory_space<vmem>>, %arg7: memref<1x128xf32, #tpu.memory_space<vmem>>, %arg8: memref<2x128xbf16, #tpu.memory_space<vmem>>) attributes {dimension_semantics = [#tpu.dimension_semantics<parallel>], iteration_bounds = array<i64: 1>, scalar_prefetch = 0 : i64, scratch_operands = 0 : i64, tpu.core_type = #tpu.core_type<tc>, window_params = [{transform_indices = @transform_0, window_bounds = array<i64: 2, 784>}, {pipeline_mode = #tpu.pipeline_mode<synchronous>, transform_indices = @transform_1, window_bounds = array<i64: 784, 128>}, {pipeline_mode = #tpu.pipeline_mode<synchronous>, transform_indices = @transform_2, window_bounds = array<i64: 1, 128>}, {pipeline_mode = #tpu.pipeline_mode<synchronous>, transform_indices = @transform_3, window_bounds = array<i64: 128, 128>}, {pipeline_mode = #tpu.pipeline_mode<synchronous>, transform_indices = @transform_4, window_bounds = array<i64: 1, 128>}, {pipeline_mode = #tpu.pipeline_mode<synchronous>, transform_indices = @transform_5, window_bounds = array<i64: 128, 128>}, {pipeline_mode = #tpu.pipeline_mode<synchronous>, transform_indices = @transform_6, window_bounds = array<i64: 1, 128>}, {transform_indices = @transform_7, window_bounds = array<i64: 2, 128>}]} {
    %c0 = arith.constant 0 : index
    %c0_0 = arith.constant 0 : index
    %0 = vector.load %arg1[%c0, %c0_0] : memref<2x784xf32, #tpu.memory_space<vmem>>, vector<2x784xf32>
    %1 = arith.truncf %0 : vector<2x784xf32> to vector<2x784xbf16>
    %c0_1 = arith.constant 0 : index
    %c0_2 = arith.constant 0 : index
    %2 = vector.load %arg2[%c0_1, %c0_2] : memref<784x128xbf16, #tpu.memory_space<vmem>>, vector<784x128xbf16>
    %cst = arith.constant dense<0.000000e+00> : vector<2x128xf32>
    %3 = tpu.matmul %1, %2, %cst {dimension_numbers = #tpu.dot_dimension_numbers<[1], [0], [0], [1], [0, 0, 1, 1], [], []>} : vector<2x784xbf16>, vector<784x128xbf16>, vector<2x128xf32> -> vector<2x128xf32>
    %c0_3 = arith.constant 0 : index
    %c0_4 = arith.constant 0 : index
    %4 = vector.load %arg3[%c0_3, %c0_4] : memref<1x128xf32, #tpu.memory_space<vmem>>, vector<1x128xf32>
    %5 = vector.broadcast %4 : vector<1x128xf32> to vector<2x128xf32>
    %6 = arith.addf %3, %5 : vector<2x128xf32>
    %cst_5 = arith.constant 0.000000e+00 : f32
    %7 = vector.broadcast %cst_5 : f32 to vector<2x128xf32>
    %8 = arith.maximumf %6, %7 : vector<2x128xf32>
    %9 = arith.truncf %8 : vector<2x128xf32> to vector<2x128xbf16>
    %c0_6 = arith.constant 0 : index
    %c0_7 = arith.constant 0 : index
    %10 = vector.load %arg4[%c0_6, %c0_7] : memref<128x128xbf16, #tpu.memory_space<vmem>>, vector<128x128xbf16>
    %cst_8 = arith.constant dense<0.000000e+00> : vector<2x128xf32>
    %11 = tpu.matmul %9, %10, %cst_8 {dimension_numbers = #tpu.dot_dimension_numbers<[1], [0], [0], [1], [0, 0, 1, 1], [], []>} : vector<2x128xbf16>, vector<128x128xbf16>, vector<2x128xf32> -> vector<2x128xf32>
    %c0_9 = arith.constant 0 : index
    %c0_10 = arith.constant 0 : index
    %12 = vector.load %arg5[%c0_9, %c0_10] : memref<1x128xf32, #tpu.memory_space<vmem>>, vector<1x128xf32>
    %13 = vector.broadcast %12 : vector<1x128xf32> to vector<2x128xf32>
    %14 = arith.addf %11, %13 : vector<2x128xf32>
    %cst_11 = arith.constant 0.000000e+00 : f32
    %15 = vector.broadcast %cst_11 : f32 to vector<2x128xf32>
    %16 = arith.maximumf %14, %15 : vector<2x128xf32>
    %17 = arith.truncf %16 : vector<2x128xf32> to vector<2x128xbf16>
    %c0_12 = arith.constant 0 : index
    %c0_13 = arith.constant 0 : index
    %18 = vector.load %arg6[%c0_12, %c0_13] : memref<128x128xbf16, #tpu.memory_space<vmem>>, vector<128x128xbf16>
    %cst_14 = arith.constant dense<0.000000e+00> : vector<2x128xf32>
    %19 = tpu.matmul %17, %18, %cst_14 {dimension_numbers = #tpu.dot_dimension_numbers<[1], [0], [0], [1], [0, 0, 1, 1], [], []>} : vector<2x128xbf16>, vector<128x128xbf16>, vector<2x128xf32> -> vector<2x128xf32>
    %c0_15 = arith.constant 0 : index
    %c0_16 = arith.constant 0 : index
    %20 = vector.load %arg7[%c0_15, %c0_16] : memref<1x128xf32, #tpu.memory_space<vmem>>, vector<1x128xf32>
    %21 = vector.broadcast %20 : vector<1x128xf32> to vector<2x128xf32>
    %22 = arith.addf %19, %21 : vector<2x128xf32>
    %23 = arith.truncf %22 : vector<2x128xf32> to vector<2x128xbf16>
    %c0_17 = arith.constant 0 : index
    %c0_18 = arith.constant 0 : index
    %24 = vector.load %arg8[%c0_17, %c0_18] : memref<2x128xbf16, #tpu.memory_space<vmem>>, vector<2x128xbf16>
    tpu.vector_store %arg8[%c0_17, %c0_18], %23 {strides = array<i32>} : memref<2x128xbf16, #tpu.memory_space<vmem>>, vector<2x128xbf16>,
    return
  }
  func.func @transform_0(%arg0: i32) -> (i32, i32) {
    %c0_i32 = arith.constant 0 : i32
    %c0_i32_0 = arith.constant 0 : i32
    return %arg0, %c0_i32 : i32, i32
  }
  func.func @transform_1(%arg0: i32) -> (i32, i32) {
    %c0_i32 = arith.constant 0 : i32
    %c0_i32_0 = arith.constant 0 : i32
    %c0_i32_1 = arith.constant 0 : i32
    return %c0_i32, %c0_i32_0 : i32, i32
  }
  func.func @transform_2(%arg0: i32) -> (i32, i32) {
    %c0_i32 = arith.constant 0 : i32
    %c0_i32_0 = arith.constant 0 : i32
    %c0_i32_1 = arith.constant 0 : i32
    return %c0_i32, %c0_i32_0 : i32, i32
  }
  func.func @transform_3(%arg0: i32) -> (i32, i32) {
    %c0_i32 = arith.constant 0 : i32
    %c0_i32_0 = arith.constant 0 : i32
    %c0_i32_1 = arith.constant 0 : i32
    return %c0_i32, %c0_i32_0 : i32, i32
  }
  func.func @transform_4(%arg0: i32) -> (i32, i32) {
    %c0_i32 = arith.constant 0 : i32
    %c0_i32_0 = arith.constant 0 : i32
    %c0_i32_1 = arith.constant 0 : i32
    return %c0_i32, %c0_i32_0 : i32, i32
  }
  func.func @transform_5(%arg0: i32) -> (i32, i32) {
    %c0_i32 = arith.constant 0 : i32
    %c0_i32_0 = arith.constant 0 : i32
    %c0_i32_1 = arith.constant 0 : i32
    return %c0_i32, %c0_i32_0 : i32, i32
  }
  func.func @transform_6(%arg0: i32) -> (i32, i32) {
    %c0_i32 = arith.constant 0 : i32
    %c0_i32_0 = arith.constant 0 : i32
    %c0_i32_1 = arith.constant 0 : i32
    return %c0_i32, %c0_i32_0 : i32, i32
  }
  func.func @transform_7(%arg0: i32) -> (i32, i32) {
    %c0_i32 = arith.constant 0 : i32
    %c0_i32_0 = arith.constant 0 : i32
    return %arg0, %c0_i32 : i32, i32
  }
}

</mosaic_0001>

<bundles_post_ra>
// kernel: tpu_custom_call.1
= control target key start
LH: loop header
LB: loop body
LE: loop exit
PB: predicated region body
PF: predicated region fallthrough
CT: control target
= control target key end

     0   :  { %12 = vsyncpa [#allocation3], 0  ;;  %s1488_s0 = inlined_call_operand.hbm [shape: f32[2,784], index: 0, kind: input, shape index: {}]   ;;  %s1489_s1 = inlined_call_operand.hbm [shape: bf16[784,128], index: 1, kind: input, shape index: {}]   ;;  %s1490_s2 = inlined_call_operand.vmem [shape: f32[1,128], index: 2, kind: input, shape index: {}]   ;;  %s1491_s3 = inlined_call_operand.hbm [shape: bf16[128,128], index: 3, kind: input, shape index: {}]   ;;  %s1492_s4 = inlined_call_operand.vmem [shape: f32[1,128], index: 4, kind: input, shape index: {}]   ;;  %s1493_s5 = inlined_call_operand.hbm [shape: bf16[128,128], index: 5, kind: input, shape index: {}]   ;;  %s1494_s6 = inlined_call_operand.vmem [shape: f32[1,128], index: 6, kind: input, shape index: {}]   ;;  %s1495_s7 = inlined_call_operand.hbm [shape: bf16[2,128], index: 7, kind: output, shape index: {}]  }
   0x1   :  { %13 = vsyncpa [#allocation6], 0 }
   0x2   :  { %14 = vsyncpa [#allocation9], 0 }
   0x3   :  { %15 = vsyncpa [#allocation4], 0  ;;  %s1336_s24 = smov [#allocation5]   ;;  %s1218_s28 = scalar_lea.hbm %s1489_s1, 6272 }
   0x4   :  { %s31_s25 = sshll.u32 %s1336_s24, 4  ;;  %p1219_p0 = scmp.ne.s32.totalorder %s1489_s1, %s1218_s28  ;;  %s32_s25 = int_to_ptr.vmem [resolvable:$true] %s31_s25 }
   0x5   :  { %p1222_p1 = scmp.lt.u32.totalorder %s1218_s28, %s1489_s1 }
   0x7   :  { %p1224_p2 = pnand %p1222_p1, %p1219_p0 }
   0x9   :  { %1227 = shalt.err (!%p1224_p2)
}
   0xa   :  { %s1228_s10 = scalar_lea.vmem %s32_s25, 6272  ;;  %p1233_p4 = scmp.lt.s32.totalorder %s32_s25, %s32_s25 }
   0xb   :  { %p1229_p3 = scmp.ne.s32.totalorder %s32_s25, %s1228_s10  ;;  %p1234_p5 = scmp.lt.s32.totalorder %s1228_s10, %s1228_s10 }
   0xd   :  { %p1235_p6 = por %p1234_p5, %p1233_p4 }
   0xf   :  { %p1236_p7 = pnand %p1235_p6, %p1229_p3 }
  0x11   :  { %1239 = shalt.err (!%p1236_p7)
}
  0x12   :  { %s1337_s11 = smov 64   ;;  %s1338_s12 = smov 4  }
  0x13   :  { %37 = dma.hbm_to_vmem [thread:$0]  %s1489_s1, 6272, %s32_s25, [#allocation6], %s1337_s11, %s1337_s11, %s1338_s12  }
  0x14   :  { %s1339_s15 = smov [#allocation2]   ;;  %s1340_s17 = smov [#allocation7]  }
  0x15   :  { %s22_s16 = sshll.u32 %s1339_s15, 4  ;;  %s45_s18 = sshll.u32 %s1340_s17, 4  ;;  %s23_s16 = int_to_ptr.vmem [resolvable:$true] %s22_s16  ;;  %s46_s18 = int_to_ptr.vmem [resolvable:$true] %s45_s18 }
  0x16   :  { %s1240_s21 = scalar_lea.hbm %s1488_s0, 224 }
  0x17   :  { %p1241_p8 = scmp.ne.s32.totalorder %s1488_s0, %s1240_s21  ;;  %p1244_p9 = scmp.lt.u32.totalorder %s1240_s21, %s1488_s0 }
  0x19   :  { %p1246_p10 = pnand %p1244_p9, %p1241_p8 }
  0x1b   :  { %1249 = shalt.err (!%p1246_p10)
}
  0x1c   :  { %s1250_s1 = scalar_lea.vmem %s23_s16, 224  ;;  %p1255_p12 = scmp.lt.s32.totalorder %s23_s16, %s23_s16 }
  0x1d   :  { %p1251_p11 = scmp.ne.s32.totalorder %s23_s16, %s1250_s1  ;;  %p1256_p13 = scmp.lt.s32.totalorder %s1250_s1, %s1250_s1 }
  0x1f   :  { %p1257_p0 = por %p1256_p13, %p1255_p12 }
  0x21   :  { %p1258_p1 = pnand %p1257_p0, %p1251_p11 }
  0x23   :  { %1261 = shalt.err (!%p1258_p1)
}
  0x24   :  { %25 = dma.hbm_to_vmem [thread:$0]  %s1488_s0, 224, %s23_s16, [#allocation3]  }
  0x25   :  { %s1262_s30 = scalar_lea.hbm %s1491_s3, 1024 }
  0x26   :  { %p1263_p2 = scmp.ne.s32.totalorder %s1491_s3, %s1262_s30  ;;  %p1266_p3 = scmp.lt.u32.totalorder %s1262_s30, %s1491_s3 }
  0x28   :  { %p1268_p4 = pnand %p1266_p3, %p1263_p2 }
  0x2a   :  { %1271 = shalt.err (!%p1268_p4)
}
  0x2b   :  { %s1272_s14 = scalar_lea.vmem %s46_s18, 1024  ;;  %p1277_p6 = scmp.lt.s32.totalorder %s46_s18, %s46_s18 }
  0x2c   :  { %p1273_p5 = scmp.ne.s32.totalorder %s46_s18, %s1272_s14  ;;  %p1278_p7 = scmp.lt.s32.totalorder %s1272_s14, %s1272_s14 }
  0x2e   :  { %p1279_p8 = por %p1278_p7, %p1277_p6 }
  0x30   :  { %p1280_p9 = pnand %p1279_p8, %p1273_p5 }
  0x32   :  { %1283 = shalt.err (!%p1280_p9)
}
  0x33   :  { %51 = dma.hbm_to_vmem [thread:$0]  %s1491_s3, 1024, %s46_s18, [#allocation6], %s1337_s11, %s1337_s11, %s1338_s12  }
  0x34   :  { %s1341_s16 = smov [#allocation8]   ;;  %s1284_s21 = scalar_lea.hbm %s1493_s5, 1024 }
  0x35   :  { %s59_s17 = sshll.u32 %s1341_s16, 4  ;;  %p1285_p10 = scmp.ne.s32.totalorder %s1493_s5, %s1284_s21  ;;  %s60_s17 = int_to_ptr.vmem [resolvable:$true] %s59_s17 }
  0x36   :  { %p1288_p11 = scmp.lt.u32.totalorder %s1284_s21, %s1493_s5 }
  0x38   :  { %p1290_p12 = pnand %p1288_p11, %p1285_p10 }
  0x3a   :  { %1293 = shalt.err (!%p1290_p12)
}
  0x3b   :  { %s1294_s1 = scalar_lea.vmem %s60_s17, 1024  ;;  %p1299_p0 = scmp.lt.s32.totalorder %s60_s17, %s60_s17 }
  0x3c   :  { %p1295_p13 = scmp.ne.s32.totalorder %s60_s17, %s1294_s1  ;;  %p1300_p1 = scmp.lt.s32.totalorder %s1294_s1, %s1294_s1 }
  0x3e   :  { %p1301_p2 = por %p1300_p1, %p1299_p0 }
  0x40   :  { %p1302_p3 = pnand %p1301_p2, %p1295_p13 }
  0x42   :  { %1305 = shalt.err (!%p1302_p3)
}
  0x43   :  { %65 = dma.hbm_to_vmem [thread:$0]  %s1493_s5, 1024, %s60_s17, [#allocation9], %s1337_s11, %s1337_s11, %s1338_s12  }
  0x44   :  { %1328 = dma.done.wait [#allocation3], 224  }
  0x45   :  { %1329 = vsyncadd [#allocation3], 4294967072 }
  0x46   :  { %1330 = dma.done.wait [#allocation6], 7296  }
  0x47   :  { %1331 = vsyncadd [#allocation6], 4294960000 }
  0x48   :  { %1332 = dma.done.wait [#allocation9], 1024  }
  0x49   :  { %1333 = vsyncadd [#allocation9], 4294966272  ;;  %v1151_v0 = vld [vmem:[#allocation5 + $0x40] sm:$0xff]   ;;  %v1155_v4 = vld [vmem:[#allocation5 + $0x48] sm:$0xff]   ;;  %v1342_v21 = vmov 1983009808   ;;  %v89_v23 = vlaneseq }
  0x4a   :  { %v1152_v1 = vld [vmem:[#allocation5] sm:$0xff]   ;;  %1009 = vmatprep.subr.bf16.mxu0 %v1151_v0  ;;  %v1156_v5 = vld [vmem:[#allocation5 + $0x8] sm:$0xff]   ;;  %v1159_v8 = vld [vmem:[#allocation5 + $0x50] sm:$0xff]   ;;  %v87_v22 = vunpack.c.l.s4 %v1342_v21  ;;  %v1343_v45 = vmov 0.0   ;;  %vm1344_vm0 = vmmov 0   ;;  %vm531_vm1 = vcmask 130048  }
  0x4b   :  { %v1153_v2 = vld [vmem:[#allocation5 + $0xc0] sm:$0xff]   ;;  %1010 = vmatpush3.bf16.msra.mxu0 %v1152_v1  ;;  %v1157_v6 = vld [vmem:[#allocation5 + $0xc8] sm:$0xff]   ;;  %v1160_v9 = vld [vmem:[#allocation5 + $0x10] sm:$0xff]   ;;  %v90_v29 = vshrl.u32 %v89_v23, 7  ;;  %s1345_s28 = smov [#allocation10]  }
  0x4c   :  { %v1154_v3 = vld [vmem:[#allocation5 + $0x80] sm:$0xff]   ;;  %1031 = vmatprep.subr.bf16.mxu1 %v1153_v2  ;;  %1011 = vmatprep.subr.bf16.mxu0 %v1155_v4  ;;  %v1158_v7 = vld [vmem:[#allocation5 + $0x88] sm:$0xff]   ;;  %v1161_v10 = vld [vmem:[#allocation5 + $0xd0] sm:$0xff]   ;;  %v88_v28 = vunpack.c.0.s8 %v87_v22  ;;  %s929_s29 = sshll.u32 %s1345_s28, 4  ;;  %s930_s29 = int_to_ptr.vmem [resolvable:$true] %s929_s29 }
  0x4d   :  { %1032 = vmatpush3.bf16.msra.mxu1 %v1154_v3  ;;  %v1162_v11 = vld [vmem:[#allocation5 + $0x90] sm:$0xff]   ;;  %v1163_v12 = vld [vmem:[#allocation5 + $0x58] sm:$0xff]   ;;  %v1167_v16 = vld [vmem:[#allocation5 + $0x60] sm:$0xff]   ;;  %s1310_s30 = scalar_lea.vmem %s930_s29, 32  ;;  %p1311_p5 = scmp.lt.s32.totalorder %s930_s29, %s930_s29 }
  0x4e   :  { %1033 = vmatprep.subr.bf16.mxu1 %v1157_v6  ;;  %v1164_v13 = vld [vmem:[#allocation5 + $0x18] sm:$0xff]   ;;  %v1168_v17 = vld [vmem:[#allocation5 + $0x20] sm:$0xff]   ;;  %v1171_v20 = vld [vmem:[#allocation5 + $0x68] sm:$0xff]   ;;  %v91_v34 = vsub.s32 %v88_v28, %v90_v29 }
  0x4f   :  { %1012 = vmatpush3.bf16.msra.mxu0 %v1156_v5  ;;  %v1165_v14 = vld [vmem:[#allocation5 + $0xd8] sm:$0xff]   ;;  %v1169_v18 = vld [vmem:[#allocation5 + $0xe0] sm:$0xff]   ;;  %v1172_v24 = vld [vmem:[#allocation5 + $0x28] sm:$0xff]  }
  0x50   :  { %1013 = vmatprep.subr.bf16.mxu0 %v1159_v8  ;;  %v1166_v15 = vld [vmem:[#allocation5 + $0x98] sm:$0xff]   ;;  %v1170_v19 = vld [vmem:[#allocation5 + $0xa0] sm:$0xff]   ;;  %v1173_v25 = vld [vmem:[#allocation5 + $0xe8] sm:$0xff]  }
  0x51   :  { %1034 = vmatpush3.bf16.msra.mxu1 %v1158_v7  ;;  %v1174_v26 = vld [vmem:[#allocation5 + $0xa8] sm:$0xff]   ;;  %v1175_v27 = vld [vmem:[#allocation5 + $0x70] sm:$0xff]   ;;  %v1179_v33 = vld [vmem:[#allocation5 + $0x78] sm:$0xff]  }
  0x52   :  { %1035 = vmatprep.subr.bf16.mxu1 %v1161_v10  ;;  %v1176_v30 = vld [vmem:[#allocation5 + $0x30] sm:$0xff]   ;;  %v1180_v35 = vld [vmem:[#allocation5 + $0x38] sm:$0xff]   ;;  %v1183_v41 = vld [vmem:[#allocation5 + $0x140] sm:$0xff]  }
  0x53   :  { %1014 = vmatpush3.bf16.msra.mxu0 %v1160_v9  ;;  %v1177_v31 = vld [vmem:[#allocation5 + $0xf0] sm:$0xff]   ;;  %v1181_v36 = vld [vmem:[#allocation5 + $0xf8] sm:$0xff]   ;;  %v1185_v48 = vld [vmem:[#allocation5 + $0x100] sm:$0xff]  }
  0x54   :  { %1015 = vmatprep.subr.bf16.mxu0 %v1163_v12  ;;  %v1178_v32 = vld [vmem:[#allocation5 + $0xb0] sm:$0xff]   ;;  %v1182_v39 = vld [vmem:[#allocation5 + $0xb8] sm:$0xff]   ;;  %v1186_v50 = vld [vmem:[#allocation5 + $0x148] sm:$0xff]  }
  0x55   :  { %1036 = vmatpush3.bf16.msra.mxu1 %v1162_v11  ;;  %v81_v37 = vld [vmem:[#allocation2] sm:$0xff]  ;;  %v1187_v52 = vld [vmem:[#allocation5 + $0x108] sm:$0xff]   ;;  %v1192_v57 = vld [vmem:[#allocation5 + $0x160] sm:$0xff]  }
  0x56   :  { %1037 = vmatprep.subr.bf16.mxu1 %v1165_v14  ;;  %v92_v38 = vrot.slane %v81_v37, %v91_v34  ;;  %v85_v40 = vcombine.high %v81_v37, %v81_v37  ;;  %v1188_v53 = vld [vmem:[#allocation5 + $0x150] sm:$0xff]   ;;  %v1190_v55 = vld [vmem:[#allocation5 + $0x158] sm:$0xff]   ;;  %v1200_v58 = vld [vmem:[#allocation5 + $0x180] sm:$0xff]  }
  0x57   :  { %1016 = vmatpush3.bf16.msra.mxu0 %v1164_v13  ;;  %v1189_v54 = vld [vmem:[#allocation5 + $0x110] sm:$0xff]   ;;  %v1191_v56 = vld [vmem:[#allocation5 + $0x118] sm:$0xff]   ;;  %v1193_v60 = vld [vmem:[#allocation5 + $0x120] sm:$0xff]  }
  0x58   :  { %1017 = vmatprep.subr.bf16.mxu0 %v1167_v16  ;;  %v100_v42 = vcombine.high %v92_v38, %v92_v38  ;;  %v99_v43 = vrot.slane %v85_v40, %v91_v34  ;;  %v125_v44 = vpack.c.bf16 %v92_v38, %v92_v38  ;;  %v82_v59 = vld [vmem:[#allocation2 + $0x8] sm:$0x3f]  ;;  %v1194_v63 = vld [vmem:[#allocation5 + $0x168] sm:$0xff]   ;;  %v1196_v5 = vld [vmem:[#allocation5 + $0x170] sm:$0xff]  }
  0x59   :  { %1038 = vmatpush3.bf16.msra.mxu1 %v1166_v15  ;;  %v102_v61 = vcombine.high %v82_v59, %v82_v59  ;;  %v109_v62 = vrot.slane %v82_v59, %v91_v34  ;;  %v1195_v2 = vld [vmem:[#allocation5 + $0x128] sm:$0xff]   ;;  %v1197_v6 = vld [vmem:[#allocation5 + $0x130] sm:$0xff]   ;;  %v1198_v7 = vld [vmem:[#allocation5 + $0x178] sm:$0xff]  }
  0x5a   :  { %1039 = vmatprep.subr.bf16.mxu1 %v1169_v18  ;;  %v126_v46 = vpack.c.bf16 %v100_v42, %v100_v42  ;;  %v101_v47 = vcombine.high %v99_v43, %v99_v43  ;;  %v127_v49 = vpack.c.bf16 %v99_v43, %v99_v43  ;;  %v1199_v8 = vld [vmem:[#allocation5 + $0x138] sm:$0xff]   ;;  %v1202_v10 = vld [vmem:[#allocation7] sm:$0xff]   ;;  %v1203_v11 = vld [vmem:[#allocation7 + $0x8] sm:$0xff]  }
  0x5b   :  { %1018 = vmatpush3.bf16.msra.mxu0 %v1168_v17  ;;  %v116_v0 = vrot.slane %v102_v61, %v91_v34  ;;  %v117_v1 = vcombine.high %v109_v62, %v109_v62  ;;  %v129_v9 = vpack.c.bf16 %v109_v62, %v109_v62  ;;  %v1204_v12 = vld [vmem:[#allocation7 + $0x10] sm:$0xff]   ;;  %v1205_v13 = vld [vmem:[#allocation7 + $0x18] sm:$0xff]   ;;  %v1206_v14 = vld [vmem:[#allocation7 + $0x20] sm:$0xff]  }
  0x5c   :  { %1019 = vmatprep.subr.bf16.mxu0 %v1171_v20  ;;  %567 = vmatprep.mubr.bf16.mxu0 %v126_v46  ;;  %v128_v51 = vpack.c.bf16 %v101_v47, %v101_v47  ;;  %v1207_v15 = vld [vmem:[#allocation7 + $0x28] sm:$0xff]   ;;  %v1208_v16 = vld [vmem:[#allocation7 + $0x30] sm:$0xff]   ;;  %v1209_v17 = vld [vmem:[#allocation7 + $0x38] sm:$0xff]  }
  0x5d   :  { %1040 = vmatpush3.bf16.msra.mxu1 %v1170_v19  ;;  %v130_v3 = vpack.c.bf16 %v117_v1, %v117_v1  ;;  %v131_v4 = vpack.c.bf16 %v116_v0, %v116_v0  ;;  %v1210_v18 = vld [vmem:[#allocation8] sm:$0xff]   ;;  %v1211_v19 = vld [vmem:[#allocation8 + $0x8] sm:$0xff]   ;;  %v1212_v20 = vld [vmem:[#allocation8 + $0x10] sm:$0xff]  }
  0x5e   :  { %1041 = vmatprep.subr.bf16.mxu1 %v1173_v25  ;;  %607 = vmatprep.mubr.bf16.mxu1 %v128_v51  ;;  %v1213_v21 = vld [vmem:[#allocation8 + $0x18] sm:$0xff]   ;;  %v1214_v22 = vld [vmem:[#allocation8 + $0x20] sm:$0xff]   ;;  %v1215_v23 = vld [vmem:[#allocation8 + $0x28] sm:$0xff]  }
  0x5f   :  { %1020 = vmatpush3.bf16.msra.mxu0 %v1172_v24  ;;  %v940_v25 = vld [vmem:[%s1490_s2] ss:$0 sm:$0xff]  ;;  %v1216_v51 = vld [vmem:[#allocation8 + $0x30] sm:$0xff]  }
  0x60   :  { %1021 = vmatprep.subr.bf16.mxu0 %v1175_v27  ;;  %v1000_v61 = vld [vmem:[%s1494_s6] ss:$0 sm:$0xff] }
  0x61   :  { %1042 = vmatpush3.bf16.msra.mxu1 %v1174_v26 }
  0x62   :  { %1043 = vmatprep.subr.bf16.mxu1 %v1177_v31 }
  0x63   :  { %1022 = vmatpush3.bf16.msra.mxu0 %v1176_v30 }
  0x64   :  { %1023 = vmatprep.subr.bf16.mxu0 %v1179_v33 }
  0x65   :  { %1044 = vmatpush3.bf16.msra.mxu1 %v1178_v32 }
  0x66   :  { %1045 = vmatprep.subr.bf16.mxu1 %v1181_v36 }
  0x67   :  { %1024 = vmatpush3.bf16.msra.mxu0 %v1180_v35 }
  0x68   :  { %1053 = vmatprep.subr.bf16.mxu0 %v1183_v41 }
  0x69   :  { %1046 = vmatpush3.bf16.msra.mxu1 %v1182_v39 }
  0x6a   :  { %1095 = vmatprep.subr.bf16.mxu1 %v1343_v45  ;;  %568 = vmatmul.mubr.bf16.vlgmr.msra.gmra.mrb[0].mxu0 %v125_v44 }
  0x6b   :  { %1054 = vmatpush3.bf16.msra.mxu0 %v1185_v48  ;;  %647 = vmatprep.mubr.bf16.mxu0 %v130_v3 }
  0x6c   :  { %608 = vmatmul.mubr.bf16.vlgmr.msra.gmra.mrb[0].mxu1 %v127_v49  ;;  %1055 = vmatprep.subr.bf16.mxu0 %v1186_v50 }
  0x6d   :  { %1097 = vmatprep.mubr.msk.bf16.mxu1 %vm1344_vm0, %v1343_v45  ;;  %1096 = vmatpush3.bf16.msra.mxu1 %v1200_v58 }
  0x6e   :  { %1101 = vmatprep.subr.bf16.mxu1 %v1343_v45 }
  0x6f   :  { %1056 = vmatpush3.bf16.msra.mxu0 %v1187_v52  ;;  %v1217_v52 = vld [vmem:[#allocation8 + $0x38] sm:$0xff]  }
  0x70   :  { %1057 = vmatprep.subr.bf16.mxu0 %v1188_v53  ;;  %v991_v53 = vld [vmem:[%s1492_s4] ss:$0 sm:$0xff]  ;;  %s1306_s4 = scalar_lea.vmem %s930_s29, 16 }
  0x71   :  { %p1307_p4 = scmp.ne.s32.totalorder %s930_s29, %s1306_s4  ;;  %p1312_p6 = scmp.lt.s32.totalorder %s1310_s30, %s1306_s4 }
  0x73   :  { %1058 = vmatpush3.bf16.msra.mxu0 %v1189_v54  ;;  %p1313_p7 = por %p1312_p6, %p1311_p5 }
  0x74   :  { %1059 = vmatprep.subr.bf16.mxu0 %v1190_v55  ;;  %1098 = vmatmul.mubr.msk.bf16.vlgmr.msra.gmra.mrb[4].mxu1 %vm531_vm1, %v131_v4 }
  0x75   :  { %1117 = vmatprep.mubr.msk.bf16.mxu1 %vm1344_vm0, %v1343_v45  ;;  %1102 = vmatpush3.bf16.msra.mxu1 %v1202_v10  ;;  %p1314_p8 = pnand %p1313_p7, %p1307_p4 }
  0x76   :  { %1103 = vmatprep.subr.bf16.mxu1 %v1343_v45 }
  0x77   :  { %1060 = vmatpush3.bf16.msra.mxu0 %v1191_v56 }
  0x78   :  { %1061 = vmatprep.subr.bf16.mxu0 %v1192_v57 }
  0x79   :  { %1104 = vmatpush3.bf16.msra.mxu1 %v1203_v11 }
  0x7a   :  { %1105 = vmatprep.subr.bf16.mxu1 %v1343_v45 }
  0x7b   :  { %1062 = vmatpush3.bf16.msra.mxu0 %v1193_v60 }
  0x7c   :  { %1063 = vmatprep.subr.bf16.mxu0 %v1194_v63 }
  0x7d   :  { %1106 = vmatpush3.bf16.msra.mxu1 %v1204_v12 }
  0x7e   :  { %1107 = vmatprep.subr.bf16.mxu1 %v1343_v45 }
  0x7f   :  { %1064 = vmatpush3.bf16.msra.mxu0 %v1195_v2 }
  0x80   :  { %1065 = vmatprep.subr.bf16.mxu0 %v1196_v5 }
  0x81   :  { %1108 = vmatpush3.bf16.msra.mxu1 %v1205_v13 }
  0x82   :  { %1109 = vmatprep.subr.bf16.mxu1 %v1343_v45 }
  0x83   :  { %1066 = vmatpush3.bf16.msra.mxu0 %v1197_v6 }
  0x84   :  { %1067 = vmatprep.subr.bf16.mxu0 %v1198_v7 }
  0x85   :  { %1110 = vmatpush3.bf16.msra.mxu1 %v1206_v14 }
  0x86   :  { %1111 = vmatprep.subr.bf16.mxu1 %v1343_v45 }
  0x87   :  { %1068 = vmatpush3.bf16.msra.mxu0 %v1199_v8 }
  0x88   :  { %1121 = vmatprep.subr.bf16.mxu0 %v1343_v45 }
  0x89   :  { %1112 = vmatpush3.bf16.msra.mxu1 %v1207_v15 }
  0x8a   :  { %648 = vmatmul.mubr.bf16.vlgmr.msra.gmra.mrb[4].mxu0 %v129_v9  ;;  %1113 = vmatprep.subr.bf16.mxu1 %v1343_v45 }
  0x8b   :  { %1137 = vmatprep.mubr.msk.bf16.mxu0 %vm1344_vm0, %v1343_v45  ;;  %1122 = vmatpush3.bf16.msra.mxu0 %v1210_v18 }
  0x8c   :  { %1123 = vmatprep.subr.bf16.mxu0 %v1343_v45 }
  0x8d   :  { %1114 = vmatpush3.bf16.msra.mxu1 %v1208_v16 }
  0x8e   :  { %1115 = vmatprep.subr.bf16.mxu1 %v1343_v45 }
  0x8f   :  { %1124 = vmatpush3.bf16.msra.mxu0 %v1211_v19 }
  0x90   :  { %1125 = vmatprep.subr.bf16.mxu0 %v1343_v45 }
  0x91   :  { %1116 = vmatpush3.bf16.msra.mxu1 %v1209_v17 }
  0x93   :  { %1126 = vmatpush3.bf16.msra.mxu0 %v1212_v20 }
  0x94   :  { %1127 = vmatprep.subr.bf16.mxu0 %v1343_v45 }
  0x97   :  { %1128 = vmatpush3.bf16.msra.mxu0 %v1213_v21 }
  0x98   :  { %1129 = vmatprep.subr.bf16.mxu0 %v1343_v45 }
  0x9b   :  { %1130 = vmatpush3.bf16.msra.mxu0 %v1214_v22 }
  0x9c   :  { %1131 = vmatprep.subr.bf16.mxu0 %v1343_v45 }
  0x9f   :  { %1132 = vmatpush3.bf16.msra.mxu0 %v1215_v23 }
  0xa0   :  { %1133 = vmatprep.subr.bf16.mxu0 %v1343_v45 }
  0xa3   :  { %1134 = vmatpush3.bf16.msra.mxu0 %v1216_v51 }
  0xa4   :  { %1135 = vmatprep.subr.bf16.mxu0 %v1343_v45 }
  0xa7   :  { %1136 = vmatpush3.bf16.msra.mxu0 %v1217_v52 }
 0x13d   :  { %v1025_v24 = vpop.f32.mrb[0].mxu0 }
 0x13e   :  { %v1026_v26 = vpop.f32.mrb[1].mxu0 }
 0x13f   :  { %v1027_v27 = vadd.f32 %v1026_v26, %v1025_v24  ;;  %v1028_v28 = vpop.f32.mrb[2].mxu0  ;;  %v1047_v29 = vpop.f32.mrb[0].mxu1 }
 0x140   :  { %v1029_v30 = vpop.f32.mrb[3].mxu0  ;;  %v1048_v31 = vpop.f32.mrb[1].mxu1 }
 0x141   :  { %v570_v32 = vadd.f32 %v1027_v27, %v940_v25  ;;  %v1049_v33 = vadd.f32 %v1048_v31, %v1047_v29  ;;  %v1050_v34 = vpop.f32.mrb[2].mxu1 }
 0x142   :  { %v1051_v35 = vpop.f32.mrb[3].mxu1 }
 0x143   :  { %v610_v36 = vadd.f32 %v1049_v33, %v570_v32 }
 0x147   :  { %v689_v37 = vpop.f32.mrb[4].mxu1 }
 0x148   :  { %v1099_v38 = vpop.f32.mrb[5].mxu1 }
 0x149   :  { %v692_v39 = vpop.f32.mrb[6].mxu1 }
 0x14a   :  { %v1100_v40 = vpop.f32.mrb[7].mxu1 }
 0x15d   :  { %v1069_v41 = vpop.f32.mrb[4].mxu0 }
 0x15e   :  { %v1070_v42 = vpop.f32.mrb[5].mxu0 }
 0x15f   :  { %v1071_v43 = vadd.f32 %v1070_v42, %v1069_v41  ;;  %v1072_v44 = vpop.f32.mrb[6].mxu0 }
 0x160   :  { %v1073_v46 = vpop.f32.mrb[7].mxu0 }
 0x161   :  { %v650_v47 = vadd.f32 %v1071_v43, %v610_v36 }
 0x163   :  { %v690_v48 = vadd.f32 %v689_v37, %v650_v47 }
 0x165   :  { %v695_v49 = vmax.f32 %v690_v48, 0.0 }
 0x167   :  { %v696_v50 = vpack.c.bf16 %v695_v49, %v695_v49 }
 0x169   :  { %1118 = vmatmul.mubr.bf16.vlgmr.msra.gmra.mrb[8].mxu1 %v696_v50 }
 0x23c   :  { %v802_v54 = vpop.f32.mrb[8].mxu1 }
 0x23d   :  { %v803_v55 = vadd.f32 %v991_v53, %v802_v54  ;;  %v1119_v56 = vpop.f32.mrb[9].mxu1 }
 0x23e   :  { %v805_v57 = vpop.f32.mrb[10].mxu1 }
 0x23f   :  { %v808_v58 = vmax.f32 %v803_v55, 0.0  ;;  %v1120_v59 = vpop.f32.mrb[11].mxu1 }
 0x241   :  { %v809_v60 = vpack.c.bf16 %v808_v58, %v808_v58 }
 0x243   :  { %1138 = vmatmul.mubr.bf16.vlgmr.msra.gmra.mrb[8].mxu0 %v809_v60 }
 0x316   :  { %v915_v62 = vpop.f32.mrb[8].mxu0 }
 0x317   :  { %v916_v45 = vadd.f32 %v1000_v61, %v915_v62  ;;  %v1139_v63 = vpop.f32.mrb[9].mxu0 }
 0x318   :  { %v918_v0 = vpop.f32.mrb[10].mxu0 }
 0x319   :  { %v921_v1 = vpack.c.bf16 %v916_v45, %v916_v45  ;;  %v1140_v2 = vpop.f32.mrb[11].mxu0 }
 0x31b   :  { %922 = vst [vmem:[#allocation10] sm:$0x1] %v921_v1 }
 0x31c   :  { %1317 = shalt.err (!%p1314_p8)
}
 0x31d   :  { %s1318_s9 = scalar_lea.hbm %s1495_s7, 16 }
 0x31e   :  { %p1319_p9 = scmp.ne.s32.totalorder %s1495_s7, %s1318_s9  ;;  %p1322_p10 = scmp.lt.u32.totalorder %s1318_s9, %s1495_s7 }
 0x320   :  { %p1324_p11 = pnand %p1322_p10, %p1319_p9 }
 0x322   :  { %1327 = shalt.err (!%p1324_p11)
}
 0x323   :  { %932 = dma.vmem_to_hbm [thread:$0]  %s930_s29, 16, %s1495_s7, [#allocation4]  }
 0x324   :  { %1334 = dma.done.wait [#allocation4], 16  }
 0x325   :  { %1335 = vsyncadd [#allocation4], 4294967280 }
 0x326   :  { %936 = vsyncpa [#allocation3], 1 }
 0x327   :  { %937 = vsyncpa [#allocation6], 1 }
 0x328   :  { %938 = vsyncpa [#allocation9], 1 }
 0x329   :  { %939 = vsyncpa [#allocation4], 1 }

</bundles_post_ra>
